<compile_context>
chip_gen: v6e
topology: v6e:2x2x1
jax: 0.10.0
libtpu: 0.0.40
codegen_flags: <defaults>
</compile_context>

<pallas_src>
import math
import numpy as np

import jax
import jax.numpy as jnp
from jax.experimental import pallas as pl
from jax.experimental.pallas import tpu as pltpu


# ----------------------------------------------------------------------------
# Positional-encoding table (matches the PyTorch __init__ loop exactly).
# ----------------------------------------------------------------------------
def make_pe_table(max_len, d_model):
    if d_model % 2 != 0:
        # The PyTorch loop writes pe[pos, i + 1] for i in range(0, d_model, 2)
        # and would raise on odd d_model as well.
        raise ValueError("d_model must be even (PyTorch reference requires it)")
    pe = np.zeros((max_len, d_model), dtype=np.float32)
    for pos in range(max_len):
        for i in range(0, d_model, 2):
            pe[pos, i] = math.sin(pos / 10000 ** (2 * i / d_model))
            pe[pos, i + 1] = math.cos(pos / 10000 ** (2 * (i + 1) / d_model))
    return jnp.asarray(pe)


# ----------------------------------------------------------------------------
# Kernel: lane-dense broadcast add of the positional encoding.
# ----------------------------------------------------------------------------
def _add_pe_kernel(x_ref, pe_ref, o_ref):
    # x_ref:  (tb, tl)  block of flattened (batch*vertex) rows
    # pe_ref: (1,  tl)  positional-encoding slab (broadcast over rows)
    # o_ref:  (tb, tl)  output in the promoted dtype
    o_ref[...] = (x_ref[...] + pe_ref[...]).astype(o_ref.dtype)


# ----------------------------------------------------------------------------
# Tiling policy helpers.
# ----------------------------------------------------------------------------
def _cdiv(a, b):
    return -(-a // b)


def _round_up(a, b):
    return _cdiv(a, b) * b


def _sublane(dtype):
    # sublane packing: 8 rows for 32-bit, 16 for 16-bit, 32 for 8-bit dtypes
    bits = jnp.dtype(dtype).itemsize * 8
    return max(8, 256 // bits)


def _tpu_params():
    """(num_tensorcores, block-sizing VMEM budget, vmem_limit_bytes)."""
    try:
        dev = jax.devices()[0]
        kind = str(getattr(dev, "device_kind", "")).lower()
    except Exception:
        kind = ""
    if "v7" in kind:
        # 2 TCs/chip, 64 MiB VMEM per TC: bigger blocks, but respect VMEM.
        num_tc, budget, limit = 2, 24 << 20, 48 << 20
    elif ("v5 lite" in kind) or ("v5lite" in kind) or ("v5e" in kind):
        # 1 TC, 128 MiB VMEM (16 MiB default scoped); lowest HBM BW.
        num_tc, budget, limit = 1, 16 << 20, 32 << 20
    else:
        # v6e and default: 1 TC, 128 MiB VMEM.
        num_tc, budget, limit = 1, 32 << 20, 64 << 20
    return num_tc, budget, limit


def _choose_tiles(rows, tf, itemsize, sub, num_tc, vmem_budget):
    """Pick (tb, tl): row-block (multiple of `sub` or == rows) and lane-block
    (multiple of 128 or == tf), byte-targeted at ~1-4 MiB per block so the
    HBM-bound add stays at the roofline while fitting double-buffered VMEM."""
    # Lane block: multiple of 128 when possible, capped so huge T*F does not
    # force a giant block (no whole-array fallback).
    if tf % 128 == 0 and tf > 32768:
        tl = 32768
    else:
        tl = tf  # full dim (exception to the 128-multiple rule, or already ok)
        # TODO(synk): if T*F is not a multiple of 128 stores are masked; pad F
        # upstream (or use F as the lane dim) for full lane density.

    # ~1-4 MiB per block; 2 double-buffered inputs/outputs + headroom.
    target = max(sub * tl * itemsize, min(4 << 20, vmem_budget // 6))
    tb = max(sub, (target // (tl * itemsize)) // sub * sub)
    if tb >= rows:
        tb = rows  # single row-step, full-dim exception

    # Balance row steps across TensorCores (v7x megacore).
    if num_tc >= 2 and rows > sub:
        if tb >= rows:
            cand = _round_up(_cdiv(rows, num_tc), sub)
            if cand < rows:
                tb = cand
        t = tb
        for _ in range(64):
            if t <= sub or _cdiv(rows, t) % num_tc == 0:
                break
            t -= sub
        if t >= sub and _cdiv(rows, t) % num_tc == 0:
            tb = t
    return tb, tl


# ----------------------------------------------------------------------------
# Wrapper.
# ----------------------------------------------------------------------------
def temporal_positional_encoding(x, pe_table, lookup_index=None, donate_x=False):
    """
    x:        (B, N, T, F_in)
    pe_table: (max_len, F_in) float32
    returns   (B, N, T, F_in) == x + pe broadcast over (B, N), eval-mode dropout
    """
    B, N, T, F = x.shape
    if lookup_index is not None:
        pe_t = pe_table[jnp.asarray(lookup_index)]            # (T, F)
    else:
        pe_t = pe_table[:T]                                    # (T, F)

    rows = B * N
    tf = T * F
    out_dtype = jnp.promote_types(x.dtype, pe_t.dtype)         # PyTorch promotion

    # Free reshapes (merge contiguous trailing dims) -> lane-dense last dim.
    x2 = x.reshape(rows, tf)
    pe2 = pe_t.reshape(1, tf)

    num_tc, vmem_budget, vmem_limit = _tpu_params()
    itemsize = max(jnp.dtype(x.dtype).itemsize, jnp.dtype(out_dtype).itemsize)
    sub = _sublane(x.dtype)
    tb, tl = _choose_tiles(rows, tf, itemsize, sub, num_tc, vmem_budget)

    grid = (_cdiv(rows, tb), _cdiv(tf, tl))

    io_aliases = {}
    if donate_x and out_dtype == x.dtype:
        io_aliases = {0: 0}   # x2 buffer reused for the output

    out2 = pl.pallas_call(
        _add_pe_kernel,
        out_shape=jax.ShapeDtypeStruct((rows, tf), out_dtype),
        grid_spec=pltpu.PrefetchScalarGridSpec(
            num_scalar_prefetch=0,
            grid=grid,
            in_specs=[
                pl.BlockSpec((tb, tl), lambda i, j: (i, j)),
                pl.BlockSpec((1, tl), lambda i, j: (0, j)),
            ],
            out_specs=pl.BlockSpec((tb, tl), lambda i, j: (i, j)),
        ),
        compiler_params=pltpu.CompilerParams(
            dimension_semantics=("parallel", "parallel"),
            vmem_limit_bytes=vmem_limit,
        ),
        input_output_aliases=io_aliases,
    )(x2, pe2)

    # TODO(synk): nn.Dropout is stochastic in training mode; eval-mode forward
    # is the identity, which is what we implement here.
    return out2.reshape(B, N, T, F)


# ----------------------------------------------------------------------------
# Pure-JAX reference mirroring the PyTorch module (eval mode).
# ----------------------------------------------------------------------------
def _reference(x, pe_table, lookup_index=None):
    T = x.shape[2]
    if lookup_index is not None:
        pe_t = pe_table[jnp.asarray(lookup_index)]
    else:
        pe_t = pe_table[:T]
    return x + pe_t[None, None, :, :]


if __name__ == "__main__":
    B, N, T, d_model, max_len = 2, 16, 8, 32, 12

    key = jax.random.PRNGKey(0)
    x = jax.random.normal(key, (B, N, T, d_model), dtype=jnp.float32)

    pe_table = make_pe_table(max_len, d_model)

    out = temporal_positional_encoding(x, pe_table)
    out = jax.block_until_ready(out)

    ref = _reference(x, pe_table)
    assert out.shape == (B, N, T, d_model), out.shape
    assert out.dtype == ref.dtype, (out.dtype, ref.dtype)
    assert jnp.allclose(out, ref, atol=1e-6, rtol=1e-6), float(
        jnp.max(jnp.abs(out - ref)))

    print("KERNEL_OK")
</pallas_src>

<mosaic_0001>
module attributes {stable_mosaic.version = 11 : i64} {
  func.func @_add_pe_kernel(%arg0: i32, %arg1: i32, %arg2: memref<32x256xf32, #tpu.memory_space<vmem>>, %arg3: memref<1x256xf32, #tpu.memory_space<vmem>>, %arg4: memref<32x256xf32, #tpu.memory_space<vmem>>) attributes {dimension_semantics = [#tpu.dimension_semantics<parallel>, #tpu.dimension_semantics<parallel>], iteration_bounds = array<i64: 1, 1>, scalar_prefetch = 0 : i64, scratch_operands = 0 : i64, tpu.core_type = #tpu.core_type<tc>, window_params = [{transform_indices = @transform_0, window_bounds = array<i64: 32, 256>}, {transform_indices = @transform_1, window_bounds = array<i64: 1, 256>}, {transform_indices = @transform_2, window_bounds = array<i64: 32, 256>}]} {
    %c0 = arith.constant 0 : index
    %c0_0 = arith.constant 0 : index
    %0 = vector.load %arg2[%c0, %c0_0] : memref<32x256xf32, #tpu.memory_space<vmem>>, vector<32x256xf32>
    %c0_1 = arith.constant 0 : index
    %c0_2 = arith.constant 0 : index
    %1 = vector.load %arg3[%c0_1, %c0_2] : memref<1x256xf32, #tpu.memory_space<vmem>>, vector<1x256xf32>
    %2 = vector.broadcast %1 : vector<1x256xf32> to vector<32x256xf32>
    %3 = arith.addf %0, %2 : vector<32x256xf32>
    %c0_3 = arith.constant 0 : index
    %c0_4 = arith.constant 0 : index
    %4 = vector.load %arg4[%c0_3, %c0_4] : memref<32x256xf32, #tpu.memory_space<vmem>>, vector<32x256xf32>
    tpu.vector_store %arg4[%c0_3, %c0_4], %3 {strides = array<i32>} : memref<32x256xf32, #tpu.memory_space<vmem>>, vector<32x256xf32>,
    return
  }
  func.func @transform_0(%arg0: i32, %arg1: i32) -> (i32, i32) {
    %c0_i32 = arith.constant 0 : i32
    return %arg0, %arg1 : i32, i32
  }
  func.func @transform_1(%arg0: i32, %arg1: i32) -> (i32, i32) {
    %c0_i32 = arith.constant 0 : i32
    %c0_i32_0 = arith.constant 0 : i32
    return %c0_i32, %arg1 : i32, i32
  }
  func.func @transform_2(%arg0: i32, %arg1: i32) -> (i32, i32) {
    %c0_i32 = arith.constant 0 : i32
    return %arg0, %arg1 : i32, i32
  }
}

</mosaic_0001>

<bundles_post_ra>
// kernel: tpu_custom_call.1
= control target key start
LH: loop header
LB: loop body
LE: loop exit
PB: predicated region body
PF: predicated region fallthrough
CT: control target
= control target key end

     0   :  { %7 = vsyncpa [#allocation3], 0  ;;  %s198_s0 = inlined_call_operand.hbm [shape: f32[32,256], index: 0, kind: input, shape index: {}]   ;;  %s199_s1 = inlined_call_operand.hbm [shape: f32[1,256], index: 1, kind: input, shape index: {}]   ;;  %s200_s2 = inlined_call_operand.hbm [shape: f32[32,256], index: 2, kind: output, shape index: {}]  }
   0x1   :  { %8 = vsyncpa [#allocation6], 0 }
   0x2   :  { %9 = vsyncpa [#allocation4], 0  ;;  %s163_s9 = smov [#allocation2]  }
   0x3   :  { %s15_s10 = sshll.u32 %s163_s9, 4  ;;  %s16_s10 = int_to_ptr.vmem [resolvable:$true] %s15_s10 }
   0x4   :  { %s105_s11 = scalar_lea.vmem %s16_s10, 1024  ;;  %p110_p1 = scmp.lt.s32.totalorder %s16_s10, %s16_s10 }
   0x5   :  { %p106_p0 = scmp.ne.s32.totalorder %s16_s10, %s105_s11  ;;  %p111_p2 = scmp.lt.s32.totalorder %s105_s11, %s105_s11 }
   0x7   :  { %p112_p3 = por %p111_p2, %p110_p1 }
   0x9   :  { %p113_p4 = pnand %p112_p3, %p106_p0 }
   0xb   :  { %116 = shalt.err (!%p113_p4)
}
   0xc   :  { %s164_s12 = smov 256   ;;  %s165_s13 = smov 16  }
   0xd   :  { %21 = dma.hbm_to_vmem [thread:$0]  %s198_s0, 1024, %s16_s10, [#allocation3], %s164_s12, %s164_s12, %s165_s13  }
   0xe   :  { %s166_s16 = smov [#allocation5]  }
   0xf   :  { %s28_s17 = sshll.u32 %s166_s16, 4  ;;  %s29_s17 = int_to_ptr.vmem [resolvable:$true] %s28_s17 }
  0x10   :  { %s125_s18 = scalar_lea.vmem %s29_s17, 32  ;;  %p130_p6 = scmp.lt.s32.totalorder %s29_s17, %s29_s17 }
  0x11   :  { %p126_p5 = scmp.ne.s32.totalorder %s29_s17, %s125_s18  ;;  %p131_p7 = scmp.lt.s32.totalorder %s125_s18, %s125_s18 }
  0x13   :  { %p132_p8 = por %p131_p7, %p130_p6 }
  0x15   :  { %p133_p9 = pnand %p132_p8, %p126_p5 }
  0x17   :  { %136 = shalt.err (!%p133_p9)
}
  0x18   :  { %31 = dma.hbm_to_vmem [thread:$0]  %s199_s1, 32, %s29_s17, [#allocation6]  }
  0x19   :  { %157 = dma.done.wait [#allocation3], 1024  }
  0x1a   :  { %158 = vsyncadd [#allocation3], 4294966272 }
  0x1b   :  { %159 = dma.done.wait [#allocation6], 32  }
  0x1c   :  { %160 = vsyncadd [#allocation6], 4294967264  ;;  %v48_v0 = vlaneseq  ;;  %v38_v4 = vld [vmem:[#allocation2] sm:$0xff]  ;;  %v39_v6 = vld [vmem:[#allocation2 + $0x8] sm:$0xff]  ;;  %s167_s0 = smov [#allocation7]  }
  0x1d   :  { %v46_v5 = vld [vmem:[#allocation5] sm:$0x3]  ;;  %v40_v9 = vld [vmem:[#allocation2 + $0x10] sm:$0xff]  ;;  %v41_v10 = vld [vmem:[#allocation2 + $0x18] sm:$0xff]  ;;  %s79_s21 = sshll.u32 %s167_s0, 4  ;;  %s80_s21 = int_to_ptr.vmem [resolvable:$true] %s79_s21 }
  0x1e   :  { %v49_v1 = vshrl.u32 %v48_v0, 7  ;;  %v42_v11 = vld [vmem:[#allocation2 + $0x20] sm:$0xff]  ;;  %v43_v12 = vld [vmem:[#allocation2 + $0x28] sm:$0xff]  ;;  %v44_v13 = vld [vmem:[#allocation2 + $0x30] sm:$0xff]  ;;  %s137_s1 = scalar_lea.vmem %s80_s21, 1024  ;;  %p142_p11 = scmp.lt.s32.totalorder %s80_s21, %s80_s21 }
  0x1f   :  { %v45_v14 = vld [vmem:[#allocation2 + $0x38] sm:$0xff]  ;;  %p138_p10 = scmp.ne.s32.totalorder %s80_s21, %s137_s1  ;;  %p143_p12 = scmp.lt.s32.totalorder %s137_s1, %s137_s1 }
  0x20   :  { %v50_v2 = vsub.s32 0, %v49_v1  ;;  %v54_v3 = vsub.s32 1, %v49_v1 }
  0x21   :  { %p144_p13 = por %p143_p12, %p142_p11 }
  0x22   :  { %v51_v7 = vrot.slane %v46_v5, %v50_v2  ;;  %v55_v8 = vrot.slane %v46_v5, %v54_v3 }
  0x23   :  { %p145_p0 = pnand %p144_p13, %p138_p10 }
  0x24   :  { %v58_v15 = vadd.f32 %v51_v7, %v38_v4  ;;  %v59_v16 = vadd.f32 %v55_v8, %v39_v6  ;;  %v60_v17 = vadd.f32 %v51_v7, %v40_v9  ;;  %v61_v18 = vadd.f32 %v55_v8, %v41_v10 }
  0x25   :  { %v62_v19 = vadd.f32 %v51_v7, %v42_v11  ;;  %v63_v20 = vadd.f32 %v55_v8, %v43_v12  ;;  %v64_v21 = vadd.f32 %v51_v7, %v44_v13  ;;  %v65_v22 = vadd.f32 %v55_v8, %v45_v14 }
  0x26   :  { %66 = vst [vmem:[#allocation7] sm:$0xff] %v58_v15  ;;  %67 = vst [vmem:[#allocation7 + $0x8] sm:$0xff] %v59_v16 }
  0x27   :  { %68 = vst [vmem:[#allocation7 + $0x10] sm:$0xff] %v60_v17  ;;  %69 = vst [vmem:[#allocation7 + $0x18] sm:$0xff] %v61_v18 }
  0x28   :  { %70 = vst [vmem:[#allocation7 + $0x20] sm:$0xff] %v62_v19  ;;  %71 = vst [vmem:[#allocation7 + $0x28] sm:$0xff] %v63_v20 }
  0x29   :  { %72 = vst [vmem:[#allocation7 + $0x30] sm:$0xff] %v64_v21  ;;  %73 = vst [vmem:[#allocation7 + $0x38] sm:$0xff] %v65_v22 }
  0x2a   :  { %148 = shalt.err (!%p145_p0)
}
  0x2b   :  { %85 = dma.vmem_to_hbm [thread:$0]  %s80_s21, 1024, %s200_s2, [#allocation4], %s164_s12, %s164_s12, %s165_s13  }
  0x2c   :  { %161 = dma.done.wait [#allocation4], 1024  }
  0x2d   :  { %162 = vsyncadd [#allocation4], 4294966272 }
  0x2e   :  { %89 = vsyncpa [#allocation3], 1 }
  0x2f   :  { %90 = vsyncpa [#allocation6], 1 }
  0x30   :  { %91 = vsyncpa [#allocation4], 1 }

</bundles_post_ra>
